<compile_context>
chip_gen: v5e
topology: v5e:2x2
jax: 0.10.0
libtpu: 0.0.40
codegen_flags: <defaults>
</compile_context>

<pallas_src>
import functools

import jax
import jax.numpy as jnp
from jax.experimental import pallas as pl
from jax.experimental.pallas import tpu as pltpu


# ---- static layout of the packed parameter slab ------------------------------
_D_IN, _D1, _D2, _D3, _D_OUT = 400, 64, 32, 16, 1
_W1_OFF = 0
_W2_OFF = _W1_OFF + _D_IN      # 400  (all offsets are 8-sublane aligned)
_W3_OFF = _W2_OFF + _D1        # 464
_W4_OFF = _W3_OFF + _D2        # 496
_B_OFF = _W4_OFF + _D3         # 512  (8 bias rows: 4 real + 4 zero padding)
_SLAB_ROWS = _B_OFF + 8        # 520
_SLAB_LANES = 128              # lane-dense padding (>= max fan_out)


def _mlp_kernel(x_ref, w_ref, o_ref):
    # x is already f32 and batch-padded to full sublanes by the wrapper.
    x = x_ref[...]

    # Single (8, 128) tile load of all biases; slice the *value* per layer.
    biases = w_ref[_B_OFF:_B_OFF + 8, :]

    # Linear(400, 64) + ReLU
    h = jnp.dot(x, w_ref[_W1_OFF:_W1_OFF + _D_IN, 0:_D1],
                preferred_element_type=jnp.float32) + biases[0:1, 0:_D1]
    h = jnp.maximum(h, 0.0)

    # Linear(64, 32) + ReLU
    h = jnp.dot(h, w_ref[_W2_OFF:_W2_OFF + _D1, 0:_D2],
                preferred_element_type=jnp.float32) + biases[1:2, 0:_D2]
    h = jnp.maximum(h, 0.0)

    # Linear(32, 16) + ReLU
    h = jnp.dot(h, w_ref[_W3_OFF:_W3_OFF + _D2, 0:_D3],
                preferred_element_type=jnp.float32) + biases[2:3, 0:_D3]
    h = jnp.maximum(h, 0.0)

    # Linear(16, 1) + Sigmoid.  The last weight block / bias row are
    # zero-padded to 128 lanes, so the (Bpad, 128) result stores with a full
    # unmasked vst; lane 0 holds the real logit (padded lanes hold sigmoid(0),
    # sliced off in the wrapper — never reduce over the padded output).
    z = jnp.dot(h, w_ref[_W4_OFF:_W4_OFF + _D3, :],
                preferred_element_type=jnp.float32) + biases[3:4, :]
    o_ref[...] = jax.nn.sigmoid(z)


@jax.jit
def classifier_forward(x, w_slab):
    """x: [B, C, H, W] (NCHW, C*H*W == 400). Returns [B, 1] f32 sigmoid out."""
    B = x.shape[0]
    x_flat = x.reshape(B, -1).astype(jnp.float32)            # nn.Flatten()

    # Pad batch to a multiple of 8 sublanes (min 8) -> full-tile in/out DMAs.
    B_pad = max(8, pl.cdiv(B, 8) * 8)
    x_pad = jnp.zeros((B_pad, _D_IN), jnp.float32).at[:B].set(x_flat)

    flops = 2 * B_pad * (_D_IN * _D1 + _D1 * _D2 + _D2 * _D3 + _D3 * _SLAB_LANES)
    bytes_accessed = 4 * (B_pad * _D_IN                       # x
                          + _SLAB_ROWS * _SLAB_LANES          # slab
                          + B_pad * _SLAB_LANES)              # out
    cost = pl.CostEstimate(flops=flops,
                           transcendentals=B_pad * _SLAB_LANES,  # sigmoid
                           bytes_accessed=bytes_accessed)

    vmem = pl.BlockSpec(memory_space=pltpu.MemorySpace.VMEM)
    out_padded = pl.pallas_call(
        _mlp_kernel,
        out_shape=jax.ShapeDtypeStruct((B_pad, _SLAB_LANES), jnp.float32),
        in_specs=[vmem, vmem],
        out_specs=vmem,
        compiler_params=pltpu.CompilerParams(vmem_limit_bytes=2 << 20),
        cost_estimate=cost,
    )(x_pad, w_slab)
    # Full-tile kernel output -> the module's (B, 1) shape.
    return out_padded[:B, :_D_OUT]


def init_params(key):
    """Deterministic init mirroring nn.Linear default U[-1/sqrt(fan_in), ...].

    Weights are stored transposed vs. PyTorch, i.e. shape (in, out), so the
    kernel computes y = x @ W + b which equals PyTorch's x @ W_pt.T + b.
    """
    dims = [(_D_IN, _D1), (_D1, _D2), (_D2, _D3), (_D3, _D_OUT)]
    params = []
    for (fan_in, fan_out) in dims:
        key, kw, kb = jax.random.split(key, 3)
        bound = 1.0 / jnp.sqrt(jnp.float32(fan_in))
        w = jax.random.uniform(kw, (fan_in, fan_out), jnp.float32, -bound, bound)
        b = jax.random.uniform(kb, (fan_out,), jnp.float32, -bound, bound)
        params.append((w, b))
    return params


def pack_params(params):
    """Pack the 4 (w, b) pairs into ONE (520, 128) f32 slab:
    weight blocks at rows 0..511 (lane-padded to 128), bias rows at 512..519.
    Single input DMA for all parameters."""
    w_rows, b_rows = [], []
    for (w, b) in params:
        fan_in, fan_out = w.shape
        w_pad = jnp.zeros((fan_in, _SLAB_LANES), jnp.float32).at[:, :fan_out].set(w)
        b_pad = jnp.zeros((_SLAB_LANES,), jnp.float32).at[:fan_out].set(b)
        w_rows.append(w_pad)
        b_rows.append(b_pad)
    b_block = jnp.stack(b_rows, axis=0)                          # (4, 128)
    b_block = jnp.pad(b_block, ((0, 8 - b_block.shape[0]), (0, 0)))  # (8, 128)
    slab = jnp.concatenate(w_rows + [b_block], axis=0)           # (520, 128)
    assert slab.shape == (_SLAB_ROWS, _SLAB_LANES), slab.shape
    return slab


def reference_forward(x, params):
    """Pure-JAX reference (unpacked params) for correctness checking."""
    h = x.reshape(x.shape[0], -1).astype(jnp.float32)
    (w1, b1), (w2, b2), (w3, b3), (w4, b4) = params
    h = jnp.maximum(h @ w1 + b1, 0.0)
    h = jnp.maximum(h @ w2 + b2, 0.0)
    h = jnp.maximum(h @ w3 + b3, 0.0)
    return jax.nn.sigmoid(h @ w4 + b4)


if __name__ == "__main__":
    key = jax.random.PRNGKey(0)
    key, kx = jax.random.split(key)

    # NCHW input: [batch=2, channels=4, H=10, W=10] -> flatten to 400 features.
    x = jax.random.normal(kx, (2, 4, 10, 10), dtype=jnp.float32)
    params = init_params(key)
    w_slab = pack_params(params)

    out = classifier_forward(x, w_slab)
    out = jax.block_until_ready(out)

    ref = reference_forward(x, params)
    assert out.shape == (2, 1), out.shape
    assert out.dtype == jnp.float32
    assert jnp.allclose(out, ref, atol=1e-5, rtol=1e-5), (out, ref)

    print("KERNEL_OK")
</pallas_src>

<mosaic_0001>
module attributes {stable_mosaic.version = 11 : i64} {
  func.func @_mlp_kernel(%arg0: memref<8x400xf32, #tpu.memory_space<vmem>>, %arg1: memref<520x128xf32, #tpu.memory_space<vmem>>, %arg2: memref<8x128xf32, #tpu.memory_space<vmem>>) attributes {dimension_semantics = [], scalar_prefetch = 0 : i64, scratch_operands = 0 : i64, tpu.core_type = #tpu.core_type<tc>} {
    %c0 = arith.constant 0 : index
    %c0_0 = arith.constant 0 : index
    %0 = vector.load %arg0[%c0, %c0_0] : memref<8x400xf32, #tpu.memory_space<vmem>>, vector<8x400xf32>
    %c512 = arith.constant 512 : index
    %c0_1 = arith.constant 0 : index
    %1 = vector.load %arg1[%c512, %c0_1] : memref<520x128xf32, #tpu.memory_space<vmem>>, vector<8x128xf32>
    %c0_2 = arith.constant 0 : index
    %c0_3 = arith.constant 0 : index
    %2 = vector.load %arg1[%c0_2, %c0_3] : memref<520x128xf32, #tpu.memory_space<vmem>>, vector<400x64xf32>
    %cst = arith.constant dense<0.000000e+00> : vector<8x64xf32>
    %3 = tpu.matmul %0, %2, %cst {dimension_numbers = #tpu.dot_dimension_numbers<[1], [0], [0], [1], [0, 0, 1, 1], [], []>} : vector<8x400xf32>, vector<400x64xf32>, vector<8x64xf32> -> vector<8x64xf32>
    %4 = vector.extract_strided_slice %1 {offsets = [0, 0], sizes = [1, 64], strides = [1, 1]} : vector<8x128xf32> to vector<1x64xf32>
    %5 = vector.broadcast %4 : vector<1x64xf32> to vector<8x64xf32>
    %6 = arith.addf %3, %5 : vector<8x64xf32>
    %cst_4 = arith.constant 0.000000e+00 : f32
    %7 = vector.broadcast %cst_4 : f32 to vector<8x64xf32>
    %8 = arith.maximumf %6, %7 : vector<8x64xf32>
    %c400 = arith.constant 400 : index
    %c0_5 = arith.constant 0 : index
    %9 = vector.load %arg1[%c400, %c0_5] : memref<520x128xf32, #tpu.memory_space<vmem>>, vector<64x32xf32>
    %cst_6 = arith.constant dense<0.000000e+00> : vector<8x32xf32>
    %10 = tpu.matmul %8, %9, %cst_6 {dimension_numbers = #tpu.dot_dimension_numbers<[1], [0], [0], [1], [0, 0, 1, 1], [], []>} : vector<8x64xf32>, vector<64x32xf32>, vector<8x32xf32> -> vector<8x32xf32>
    %11 = vector.extract_strided_slice %1 {offsets = [1, 0], sizes = [1, 32], strides = [1, 1]} : vector<8x128xf32> to vector<1x32xf32>
    %12 = vector.broadcast %11 : vector<1x32xf32> to vector<8x32xf32>
    %13 = arith.addf %10, %12 : vector<8x32xf32>
    %cst_7 = arith.constant 0.000000e+00 : f32
    %14 = vector.broadcast %cst_7 : f32 to vector<8x32xf32>
    %15 = arith.maximumf %13, %14 : vector<8x32xf32>
    %c464 = arith.constant 464 : index
    %c0_8 = arith.constant 0 : index
    %16 = vector.load %arg1[%c464, %c0_8] : memref<520x128xf32, #tpu.memory_space<vmem>>, vector<32x16xf32>
    %cst_9 = arith.constant dense<0.000000e+00> : vector<8x16xf32>
    %17 = tpu.matmul %15, %16, %cst_9 {dimension_numbers = #tpu.dot_dimension_numbers<[1], [0], [0], [1], [0, 0, 1, 1], [], []>} : vector<8x32xf32>, vector<32x16xf32>, vector<8x16xf32> -> vector<8x16xf32>
    %18 = vector.extract_strided_slice %1 {offsets = [2, 0], sizes = [1, 16], strides = [1, 1]} : vector<8x128xf32> to vector<1x16xf32>
    %19 = vector.broadcast %18 : vector<1x16xf32> to vector<8x16xf32>
    %20 = arith.addf %17, %19 : vector<8x16xf32>
    %cst_10 = arith.constant 0.000000e+00 : f32
    %21 = vector.broadcast %cst_10 : f32 to vector<8x16xf32>
    %22 = arith.maximumf %20, %21 : vector<8x16xf32>
    %c496 = arith.constant 496 : index
    %c0_11 = arith.constant 0 : index
    %23 = vector.load %arg1[%c496, %c0_11] : memref<520x128xf32, #tpu.memory_space<vmem>>, vector<16x128xf32>
    %cst_12 = arith.constant dense<0.000000e+00> : vector<8x128xf32>
    %24 = tpu.matmul %22, %23, %cst_12 {dimension_numbers = #tpu.dot_dimension_numbers<[1], [0], [0], [1], [0, 0, 1, 1], [], []>} : vector<8x16xf32>, vector<16x128xf32>, vector<8x128xf32> -> vector<8x128xf32>
    %25 = vector.extract_strided_slice %1 {offsets = [3, 0], sizes = [1, 128], strides = [1, 1]} : vector<8x128xf32> to vector<1x128xf32>
    %26 = vector.broadcast %25 : vector<1x128xf32> to vector<8x128xf32>
    %27 = arith.addf %24, %26 : vector<8x128xf32>
    %28 = arith.negf %27 : vector<8x128xf32>
    %29 = math.exp %28 : vector<8x128xf32>
    %cst_13 = arith.constant 1.000000e+00 : f32
    %30 = vector.broadcast %cst_13 : f32 to vector<8x128xf32>
    %31 = arith.addf %30, %29 : vector<8x128xf32>
    %32 = arith.divf %30, %31 : vector<8x128xf32>
    %c0_14 = arith.constant 0 : index
    %c0_15 = arith.constant 0 : index
    %33 = vector.load %arg2[%c0_14, %c0_15] : memref<8x128xf32, #tpu.memory_space<vmem>>, vector<8x128xf32>
    tpu.vector_store %arg2[%c0_14, %c0_15], %32 {strides = array<i32>} : memref<8x128xf32, #tpu.memory_space<vmem>>, vector<8x128xf32>,
    return
  }
}

</mosaic_0001>

<bundles_post_ra>
// kernel: classifier_forward.1
= control target key start
LH: loop header
LB: loop body
LE: loop exit
PB: predicated region body
PF: predicated region fallthrough
CT: control target
= control target key end

     0   :  { %7 = vsyncpa [#allocation3], 0  ;;  %s321_s12 = smov [#allocation2]   ;;  %s322_s14 = smov 128   ;;  %s359_s0 = inlined_call_operand.vmem [shape: f32[8,400], index: 0, kind: input, shape index: {}]   ;;  %s360_s1 = inlined_call_operand.hbm [shape: f32[520,128], index: 1, kind: input, shape index: {}]   ;;  %s361_s2 = inlined_call_operand.vmem [shape: f32[8,128], index: 2, kind: output, shape index: {}]  }
   0x1   :  { %s14_s11 = sshll.u32 %s360_s1, 4  ;;  %s16_s13 = sshll.u32 %s321_s12, 4  ;;  %s15_s11 = int_to_ptr.hbm [resolvable:$true] %s14_s11  ;;  %s17_s13 = int_to_ptr.vmem [resolvable:$true] %s16_s13 }
   0x2   :  { %s323_s15 = smov 8  }
   0x3   :  { %22 = dma.hbm_to_vmem [thread:$0]  %s15_s11, 8320, %s17_s13, [#allocation3], %s322_s14, %s322_s14, %s323_s15  }
   0x4   :  { %319 = dma.done.wait [#allocation3], 8320  }
   0x5   :  { %320 = vsyncadd [#allocation3], 4294958976  ;;  %v79_v0 = vld [vmem:[#allocation2 + $0x178] sm:$0xff]  ;;  %v78_v2 = vld [vmem:[#allocation2 + $0x170] sm:$0xff]  ;;  %vm83_vm0 = vcmask 130048   ;;  %vm177_vm1 = vcmask 523264  }
   0x6   :  { %v47_v1 = vld [vmem:[#allocation2 + $0x78] sm:$0xff]  ;;  %127 = vmatpush.msra.mxu2 %v79_v0  ;;  %v46_v3 = vld [vmem:[#allocation2 + $0x70] sm:$0xff]  ;;  %v77_v5 = vld [vmem:[#allocation2 + $0x168] sm:$0xff]  ;;  %vm207_vm2 = vcmask 261120  }
   0x7   :  { %87 = vmatpush.msra.mxu0 %v47_v1  ;;  %v63_v4 = vld [vmem:[#allocation2 + $0xf8] sm:$0xff]  ;;  %v45_v6 = vld [vmem:[#allocation2 + $0x68] sm:$0xff]  ;;  %v62_v7 = vld [vmem:[#allocation2 + $0xf0] sm:$0xff] }
   0x8   :  { %107 = vmatpush.msra.mxu1 %v63_v4  ;;  %128 = vmatpush.msra.mxu2 %v78_v2  ;;  %v61_v8 = vld [vmem:[#allocation2 + $0xe8] sm:$0xff]  ;;  %v76_v9 = vld [vmem:[#allocation2 + $0x160] sm:$0xff]  ;;  %v75_v12 = vld [vmem:[#allocation2 + $0x158] sm:$0xff] }
   0x9   :  { %88 = vmatpush.msra.mxu0 %v46_v3  ;;  %v44_v10 = vld [vmem:[#allocation2 + $0x60] sm:$0xff]  ;;  %v43_v13 = vld [vmem:[#allocation2 + $0x58] sm:$0xff]  ;;  %v74_v15 = vld [vmem:[#allocation2 + $0x150] sm:$0xff] }
   0xa   :  { %108 = vmatpush.msra.mxu1 %v62_v7  ;;  %129 = vmatpush.msra.mxu2 %v77_v5  ;;  %v60_v11 = vld [vmem:[#allocation2 + $0xe0] sm:$0xff]  ;;  %v59_v14 = vld [vmem:[#allocation2 + $0xd8] sm:$0xff]  ;;  %v42_v16 = vld [vmem:[#allocation2 + $0x50] sm:$0xff] }
   0xb   :  { %89 = vmatpush.msra.mxu0 %v45_v6  ;;  %v58_v17 = vld [vmem:[#allocation2 + $0xd0] sm:$0xff]  ;;  %v73_v18 = vld [vmem:[#allocation2 + $0x148] sm:$0xff]  ;;  %v72_v21 = vld [vmem:[#allocation2 + $0x140] sm:$0xff] }
   0xc   :  { %109 = vmatpush.msra.mxu1 %v61_v8  ;;  %130 = vmatpush.msra.mxu2 %v76_v9  ;;  %v41_v19 = vld [vmem:[#allocation2 + $0x48] sm:$0xff]  ;;  %v40_v22 = vld [vmem:[#allocation2 + $0x40] sm:$0xff]  ;;  %v71_v24 = vld [vmem:[#allocation2 + $0x138] sm:$0xff] }
   0xd   :  { %90 = vmatpush.msra.mxu0 %v44_v10  ;;  %v57_v20 = vld [vmem:[#allocation2 + $0xc8] sm:$0xff]  ;;  %v56_v23 = vld [vmem:[#allocation2 + $0xc0] sm:$0xff]  ;;  %v39_v25 = vld [vmem:[#allocation2 + $0x38] sm:$0xff] }
   0xe   :  { %110 = vmatpush.msra.mxu1 %v60_v11  ;;  %131 = vmatpush.msra.mxu2 %v75_v12  ;;  %v55_v26 = vld [vmem:[#allocation2 + $0xb8] sm:$0xff]  ;;  %v81_v27 = vld [vmem:[#allocation2 + $0x188] sm:$0xff]  ;;  %v70_v28 = vld [vmem:[#allocation2 + $0x130] sm:$0xff] }
   0xf   :  { %91 = vmatpush.msra.mxu0 %v43_v13  ;;  %v38_v29 = vld [vmem:[#allocation2 + $0x30] sm:$0xff]  ;;  %161 = vmatpush.msra.mxu3 %v81_v27  ;;  %v80_v30 = vld [vmem:[#allocation2 + $0x180] sm:$0xff]  ;;  %v30_v32 = vld [vmem:[%s359_s0 + $0x18] sm:$0xff] }
  0x10   :  { %111 = vmatpush.msra.mxu1 %v59_v14  ;;  %132 = vmatpush.msra.mxu2 %v74_v15  ;;  %v54_v31 = vld [vmem:[#allocation2 + $0xb0] sm:$0xff]  ;;  %v69_v33 = vld [vmem:[#allocation2 + $0x128] sm:$0xff]  ;;  %v68_v37 = vld [vmem:[#allocation2 + $0x120] sm:$0xff] }
  0x11   :  { %92 = vmatpush.msra.mxu0 %v42_v16  ;;  %v37_v34 = vld [vmem:[#allocation2 + $0x28] sm:$0xff]  ;;  %162 = vmatpush.msra.mxu3 %v80_v30  ;;  %v36_v38 = vld [vmem:[#allocation2 + $0x20] sm:$0xff]  ;;  %v67_v41 = vld [vmem:[#allocation2 + $0x118] sm:$0xff] }
  0x12   :  { %112 = vmatpush.msra.mxu1 %v58_v17  ;;  %133 = vmatpush.msra.mxu2 %v73_v18  ;;  %v53_v35 = vld [vmem:[#allocation2 + $0xa8] sm:$0xff]  ;;  %v52_v39 = vld [vmem:[#allocation2 + $0xa0] sm:$0xff]  ;;  %v35_v42 = vld [vmem:[#allocation2 + $0x18] sm:$0xff] }
  0x13   :  { %93 = vmatpush.msra.mxu0 %v41_v19  ;;  %v175_v36 = vld [vmem:[#allocation2 + $0x1c8] sm:$0xff]  ;;  %283 = vmatmul.msk.f32.vlgmr.msra.gmra.mxu3 %vm83_vm0, %v30_v32  ;;  %v174_v40 = vld [vmem:[#allocation2 + $0x1c0] sm:$0xff]  ;;  %v51_v43 = vld [vmem:[#allocation2 + $0x98] sm:$0xff] }
  0x14   :  { %113 = vmatpush.msra.mxu1 %v57_v20  ;;  %134 = vmatpush.msra.mxu2 %v72_v21  ;;  %v66_v44 = vld [vmem:[#allocation2 + $0x110] sm:$0xff]  ;;  %v65_v47 = vld [vmem:[#allocation2 + $0x108] sm:$0xff]  ;;  %v64_v50 = vld [vmem:[#allocation2 + $0x100] sm:$0xff] }
  0x15   :  { %94 = vmatpush.msra.mxu0 %v40_v22  ;;  %189 = vmatpush.msrb.mxu3 %v175_v36  ;;  %v34_v45 = vld [vmem:[#allocation2 + $0x10] sm:$0xff]  ;;  %v33_v48 = vld [vmem:[#allocation2 + $0x8] sm:$0xff]  ;;  %v32_v51 = vld [vmem:[#allocation2] sm:$0xff] }
  0x16   :  { %114 = vmatpush.msra.mxu1 %v56_v23  ;;  %135 = vmatpush.msra.mxu2 %v71_v24  ;;  %v50_v46 = vld [vmem:[#allocation2 + $0x90] sm:$0xff]  ;;  %v49_v49 = vld [vmem:[#allocation2 + $0x88] sm:$0xff]  ;;  %v27_v53 = vld [vmem:[%s359_s0] sm:$0xff] }
  0x17   :  { %95 = vmatpush.msra.mxu0 %v39_v25  ;;  %190 = vmatpush.msrb.mxu3 %v174_v40  ;;  %v29_v52 = vld [vmem:[%s359_s0 + $0x10] sm:$0xff]  ;;  %v48_v54 = vld [vmem:[#allocation2 + $0x80] sm:$0xff]  ;;  %v28_v55 = vld [vmem:[%s359_s0 + $0x8] sm:$0xff] }
  0x18   :  { %115 = vmatpush.msra.mxu1 %v55_v26  ;;  %136 = vmatpush.msra.mxu2 %v70_v28  ;;  %v173_v56 = vld [vmem:[#allocation2 + $0x1b8] sm:$0xff]  ;;  %v172_v57 = vld [vmem:[#allocation2 + $0x1b0] sm:$0xff]  ;;  %v171_v58 = vld [vmem:[#allocation2 + $0x1a8] sm:$0xff] }
  0x19   :  { %96 = vmatpush.msra.mxu0 %v38_v29  ;;  %191 = vmatpush.msrb.mxu3 %v173_v56  ;;  %v170_v59 = vld [vmem:[#allocation2 + $0x1a0] sm:$0xff]  ;;  %v169_v60 = vld [vmem:[#allocation2 + $0x198] sm:$0xff]  ;;  %v168_v61 = vld [vmem:[#allocation2 + $0x190] sm:$0xff] }
  0x1a   :  { %116 = vmatpush.msra.mxu1 %v54_v31  ;;  %137 = vmatpush.msra.mxu2 %v69_v33  ;;  %v205_v62 = vld [vmem:[#allocation2 + $0x1e8] sm:$0xff]  ;;  %v204_v63 = vld [vmem:[#allocation2 + $0x1e0] sm:$0xff]  ;;  %v203_v11 = vld [vmem:[#allocation2 + $0x1d8] sm:$0xff] }
  0x1b   :  { %97 = vmatpush.msra.mxu0 %v37_v34  ;;  %192 = vmatpush.msrb.mxu3 %v172_v57  ;;  %v31_v0 = vld [vmem:[#allocation2 + $0x200] sm:$0xff]  ;;  %v202_v12 = vld [vmem:[#allocation2 + $0x1d0] sm:$0xff]  ;;  %v233_v13 = vld [vmem:[#allocation2 + $0x1f8] sm:$0xff] }
  0x1c   :  { %117 = vmatpush.msra.mxu1 %v53_v35  ;;  %138 = vmatpush.msra.mxu2 %v68_v37  ;;  %v82_v1 = vperm.slane %v31_v0, 0  ;;  %v176_v14 = vperm.slane %v31_v0, 1  ;;  %v232_v18 = vld [vmem:[#allocation2 + $0x1f0] sm:$0xff]  ;;  %v206_v19 = vperm.slane %v31_v0, 2  ;;  %v234_v23 = vperm.slane %v31_v0, 3 }
  0x1d   :  { %98 = vmatpush.msra.mxu0 %v36_v38  ;;  %193 = vmatpush.msrb.mxu3 %v171_v58 }
  0x1e   :  { %118 = vmatpush.msra.mxu1 %v52_v39  ;;  %139 = vmatpush.msra.mxu2 %v67_v41 }
  0x1f   :  { %99 = vmatpush.msra.mxu0 %v35_v42  ;;  %194 = vmatpush.msrb.mxu3 %v170_v59 }
  0x20   :  { %119 = vmatpush.msra.mxu1 %v51_v43  ;;  %140 = vmatpush.msra.mxu2 %v66_v44 }
  0x21   :  { %100 = vmatpush.msra.mxu0 %v34_v45  ;;  %195 = vmatpush.msrb.mxu3 %v169_v60 }
  0x22   :  { %120 = vmatpush.msra.mxu1 %v50_v46  ;;  %141 = vmatpush.msra.mxu2 %v65_v47 }
  0x23   :  { %101 = vmatpush.msra.mxu0 %v33_v48  ;;  %196 = vmatpush.msrb.mxu3 %v168_v61 }
  0x24   :  { %121 = vmatpush.msra.mxu1 %v49_v49  ;;  %142 = vmatpush.msra.mxu2 %v64_v50 }
  0x25   :  { %102 = vmatpush.msra.mxu0 %v32_v51  ;;  %143 = vmatmul.f32.vlgmr.msra.gmra.mxu2 %v29_v52 }
  0x26   :  { %103 = vmatmul.f32.vlgmr.msra.gmra.mxu0 %v27_v53  ;;  %122 = vmatpush.msra.mxu1 %v48_v54 }
  0x27   :  { %123 = vmatmul.f32.vlgmr.msra.gmra.mxu1 %v28_v55  ;;  %223 = vmatpush.msra.mxu3 %v205_v62 }
  0x29   :  { %224 = vmatpush.msra.mxu3 %v204_v63 }
  0x2b   :  { %225 = vmatpush.msra.mxu3 %v203_v11 }
  0x2d   :  { %226 = vmatpush.msra.mxu3 %v202_v12 }
  0x96   :  { %v164_v7 = vpop.f32.mrf.mxu3 }
  0xa3   :  { %v104_v2 = vpop.f32.mrf.mxu0 }
  0xa4   :  { %v105_v3 = vadd.f32 %v104_v2, %v82_v1  ;;  %v124_v4 = vpop.f32.mrf.mxu1 }
  0xa6   :  { %v125_v5 = vadd.f32 %v124_v4, %v105_v3 }
  0xa8   :  { %v144_v6 = vpop.f32.mrf.mxu2 }
  0xa9   :  { %v145_v8 = vadd.f32 %v144_v6, %v125_v5 }
  0xab   :  { %v165_v9 = vadd.f32 %v164_v7, %v145_v8 }
  0xad   :  { %v167_v10 = vmax.f32 %v165_v9, 0.0 }
  0xaf   :  { %284 = vmatmul.msk.f32.vlgmr.msrb.gmra.mxu3 %vm177_vm1, %v167_v10 }
  0xb0   :  { %252 = vmatpush.msrb.mxu3 %v233_v13 }
  0xb2   :  { %253 = vmatpush.msrb.mxu3 %v232_v18 }
 0x132   :  { %v198_v15 = vpop.f32.mrf.mxu3 }
 0x133   :  { %v199_v16 = vadd.f32 %v198_v15, %v176_v14 }
 0x135   :  { %v201_v17 = vmax.f32 %v199_v16, 0.0 }
 0x137   :  { %285 = vmatmul.msk.f32.vlgmr.msra.gmra.mxu3 %vm207_vm2, %v201_v17 }
 0x1ba   :  { %v228_v20 = vpop.f32.mrf.mxu3 }
 0x1bb   :  { %v229_v21 = vadd.f32 %v228_v20, %v206_v19 }
 0x1bd   :  { %v231_v22 = vmax.f32 %v229_v21, 0.0 }
 0x1bf   :  { %286 = vmatmul.msk.f32.vlgmr.msrb.gmra.mxu3 %vm83_vm0, %v231_v22 }
 0x242   :  { %v255_v24 = vpop.f32.mrf.mxu3 }
 0x243   :  { %v256_v25 = vadd.f32 %v255_v24, %v234_v23 }
 0x245   :  { %v287_v26 = vmul.f32 -1.442695, %v256_v25 }
 0x247   :  { %291 = vpow2.f32 %v287_v26 }
 0x24d   :  { %v292_v27 = vpop.eup %291 }
 0x24e   :  { %v261_v28 = vadd.f32 1.0, %v292_v27 }
 0x250   :  { %293 = vrcp.f32 %v261_v28  ;;  %v273_v32 = vand.u32 2147483648, %v261_v28  ;;  %v271_v34 = vand.u32 2147483647, %v261_v28  ;;  %vm267_vm4 = vweird.f32 %v261_v28 }
 0x252   :  { %v274_v36 = vor.u32 1.1754944e-38, %v273_v32  ;;  %vm272_vm6 = vcmp.eq.f32.partialorder %v271_v34, 8.507059e+37 }
 0x256   :  { %v294_v29 = vpop.eup %293 }
 0x257   :  { %v263_v30 = vmul.f32 %v294_v29, %v261_v28  ;;  %vm268_vm3 = vweird.f32 %v294_v29 }
 0x258   :  { %vm269_vm5 = vmor %vm267_vm4, %vm268_vm3 }
 0x259   :  { %v264_v31 = vsub.f32 1.0, %v263_v30 }
 0x25b   :  { %v265_v33 = vmul.f32 %v294_v29, %v264_v31 }
 0x25d   :  { %v266_v35 = vadd.f32 %v294_v29, %v265_v33 }
 0x25f   :  { %v270_v37 = vsel %vm269_vm5, %v294_v29, %v266_v35 }
 0x260   :  { %v275_v38 = vsel %vm272_vm6, %v274_v36, %v270_v37 }
 0x261   :  { %277 = vst [vmem:[%s361_s2] sm:$0xff] %v275_v38 }
 0x262   :  { %282 = vsyncpa [#allocation3], 1 }

</bundles_post_ra>
